<compile_context>
chip_gen: v7x
topology: tpu7x:2x2x1
jax: 0.10.0
libtpu: 0.0.40
codegen_flags: <defaults>
</compile_context>

<pallas_src>
import jax
import jax.numpy as jnp
from jax.experimental import pallas as pl
from jax.experimental.pallas import tpu as pltpu

INPUT_DIM = 60
HIDDEN_DIM = 32
CODE_DIM = 16

_DEFAULT_TILE_F32 = 8192     # multiple of 256 -> full MXU M dim
_DEFAULT_TILE_16BIT = 16384  # bf16/fp16: same VMEM footprint, half HBM bytes


def _round_up(n, m):
    return ((n + m - 1) // m) * m


def _autoencoder_kernel(x_ref,
                        w1_ref, b1_ref,
                        w2_ref, b2_ref,
                        w3_ref, b3_ref,
                        w4_ref, b4_ref,
                        out_ref):
    """Fused forward for one batch tile: 4 matmuls + biases + ReLUs.

    Rows past the true batch (last partial block) read undefined data and
    their stores are discarded by Pallas; rows are independent, so in-bounds
    outputs are unaffected.
    """

    def linear(a, w_ref, b_ref, relu):
        # MXU matmul with f32 accumulation. The astype is a no-op on the f32
        # path; on the bf16 path it casts activations to bf16 before each
        # matmul (MXU-friendly, slightly looser than pure-f32 intermediates).
        # Bias add / ReLU stay f32 (v5e VPU has no bf16 ALU path).
        y = jnp.dot(a.astype(w_ref.dtype), w_ref[...],
                    preferred_element_type=jnp.float32) + b_ref[...]
        return jnp.maximum(y, 0.0) if relu else y

    x = x_ref[...]
    h = linear(x, w1_ref, b1_ref, relu=True)     # encoder: 60 -> 32, ReLU
    z = linear(h, w2_ref, b2_ref, relu=True)     # encoder: 32 -> 16, ReLU
    d = linear(z, w3_ref, b3_ref, relu=True)     # decoder: 16 -> 32, ReLU
    y = linear(d, w4_ref, b4_ref, relu=False)    # decoder: 32 -> 60
    out_ref[...] = y.astype(out_ref.dtype)


def autoencoder_forward(x, params, *, batch_tile=None, core_parallel=False):
    """x: (B, INPUT_DIM). params: dict of transposed weights / f32 biases.

    core_parallel=True shards the batch grid axis across TensorCores
    (useful on v7x's 2-TC chips; leave False on single-TC v5e/v6e).
    """
    B, D = x.shape
    assert D == INPUT_DIM
    w1, b1 = params["w1"], params["b1"]
    w2, b2 = params["w2"], params["b2"]
    w3, b3 = params["w3"], params["b3"]
    w4, b4 = params["w4"], params["b4"]

    x_itemsize = jnp.dtype(x.dtype).itemsize
    out_dtype = x.dtype
    out_itemsize = jnp.dtype(out_dtype).itemsize
    # Packed sublane tile: 8 rows for 4-byte dtypes, 16 for 2-byte, 32 for 1-byte.
    sublane = max(8, 32 // x_itemsize)

    if batch_tile is None:
        batch_tile = _DEFAULT_TILE_F32 if x_itemsize >= 4 else _DEFAULT_TILE_16BIT
    # Tile: never larger than the sublane-rounded batch, always a sublane
    # multiple (satisfies the (8/16, 128) block constraint; last dim is the
    # full 60-wide feature axis).
    tb = min(_round_up(batch_tile, sublane), _round_up(B, sublane))
    grid = (pl.cdiv(B, tb),)

    def resident(a):
        # Constant block index -> Pallas keeps the block VMEM-resident across
        # grid steps (weights/biases DMA'd once, not per step).
        return pl.BlockSpec(a.shape, lambda i, _nd=a.ndim: (0,) * _nd)

    param_bytes = sum(int(a.size) * jnp.dtype(a.dtype).itemsize
                      for a in (w1, b1, w2, b2, w3, b3, w4, b4))
    flops = 2 * B * (INPUT_DIM * HIDDEN_DIM + HIDDEN_DIM * CODE_DIM
                     + CODE_DIM * HIDDEN_DIM + HIDDEN_DIM * INPUT_DIM)
    # x read once + out written once (true batch), params counted once per call.
    bytes_accessed = B * INPUT_DIM * (x_itemsize + out_itemsize) + param_bytes

    # Double-buffered x/out tiles + resident params. Only raise the scoped
    # VMEM limit when the smallest default (16 MiB on v5e) could be tight;
    # 1.25x margin keeps headroom under v7x's 64 MiB physical VMEM.
    vmem_need = 2 * tb * INPUT_DIM * (x_itemsize + out_itemsize) + param_bytes
    vmem_limit = int(vmem_need * 1.25) + (1 << 20) if vmem_need > (12 << 20) else None

    dims = (pltpu.CORE_PARALLEL,) if core_parallel else ("parallel",)

    return pl.pallas_call(
        _autoencoder_kernel,
        out_shape=jax.ShapeDtypeStruct((B, INPUT_DIM), out_dtype),
        grid=grid,
        in_specs=[
            pl.BlockSpec((tb, INPUT_DIM), lambda i: (i, 0)),
            resident(w1), resident(b1),
            resident(w2), resident(b2),
            resident(w3), resident(b3),
            resident(w4), resident(b4),
        ],
        out_specs=pl.BlockSpec((tb, INPUT_DIM), lambda i: (i, 0)),
        compiler_params=pltpu.CompilerParams(
            dimension_semantics=dims,
            vmem_limit_bytes=vmem_limit),
        cost_estimate=pl.CostEstimate(
            flops=flops, transcendentals=0, bytes_accessed=bytes_accessed),
    )(x, w1, b1, w2, b2, w3, b3, w4, b4)


def init_params(key, input_dim=INPUT_DIM, hidden_dim=HIDDEN_DIM, code_dim=CODE_DIM):
    """Init mirroring PyTorch Linear default (uniform +-1/sqrt(fan_in)).

    Weights are stored as (in_features, out_features) -- transposed relative
    to nn.Linear's (out, in) -- so the kernel computes x @ W + b. Biases are
    f32, shaped (1, out_features) for sublane broadcast.
    """
    def linear(k, fan_in, fan_out):
        kw, kb = jax.random.split(k)
        bound = 1.0 / (fan_in ** 0.5)
        w = jax.random.uniform(kw, (fan_in, fan_out), jnp.float32, -bound, bound)
        b = jax.random.uniform(kb, (1, fan_out), jnp.float32, -bound, bound)
        return w, b

    k1, k2, k3, k4 = jax.random.split(key, 4)
    w1, b1 = linear(k1, input_dim, hidden_dim)   # encoder Linear(60, 32)
    w2, b2 = linear(k2, hidden_dim, code_dim)    # encoder Linear(32, 16)
    w3, b3 = linear(k3, code_dim, hidden_dim)    # decoder Linear(16, 32)
    w4, b4 = linear(k4, hidden_dim, input_dim)   # decoder Linear(32, 60)
    return {"w1": w1, "b1": b1, "w2": w2, "b2": b2,
            "w3": w3, "b3": b3, "w4": w4, "b4": b4}


def reference_forward(x, p):
    h = jnp.maximum(x @ p["w1"] + p["b1"], 0.0)
    z = jnp.maximum(h @ p["w2"] + p["b2"], 0.0)
    d = jnp.maximum(z @ p["w3"] + p["b3"], 0.0)
    return d @ p["w4"] + p["b4"]


if __name__ == "__main__":
    key = jax.random.PRNGKey(0)
    k_params, k_x = jax.random.split(key)

    params = init_params(k_params)

    # f32 path: strict check vs pure-JAX reference.
    batch = 8
    x = jax.random.normal(k_x, (batch, INPUT_DIM), dtype=jnp.float32)
    out = jax.block_until_ready(autoencoder_forward(x, params))
    ref = reference_forward(x, params)
    assert out.shape == (batch, INPUT_DIM)
    assert jnp.allclose(out, ref, atol=1e-5, rtol=1e-5), "f32 mismatch vs reference"

    # bf16 I/O path (halves HBM traffic; f32 MXU accumulation; activations
    # are rounded to bf16 before each matmul -> looser tolerance).
    params_bf16 = {k: (v.astype(jnp.bfloat16) if k.startswith("w") else v)
                   for k, v in params.items()}
    x_bf16 = jax.random.normal(jax.random.PRNGKey(2), (16, INPUT_DIM),
                               jnp.float32).astype(jnp.bfloat16)
    out_bf16 = jax.block_until_ready(autoencoder_forward(x_bf16, params_bf16))
    ref_bf16 = reference_forward(x_bf16.astype(jnp.float32), params)
    assert out_bf16.shape == (16, INPUT_DIM)
    assert jnp.allclose(out_bf16.astype(jnp.float32), ref_bf16,
                        atol=1e-1, rtol=1e-1), "bf16 mismatch vs reference"

    # Ragged batch (not a multiple of the tile): exercises the multi-step grid
    # with a partial last block (no pad/slice wrapper round trips).
    x2 = jax.random.normal(jax.random.PRNGKey(1), (13, INPUT_DIM), jnp.float32)
    out2 = jax.block_until_ready(autoencoder_forward(x2, params, batch_tile=8))
    ref2 = reference_forward(x2, params)
    assert out2.shape == (13, INPUT_DIM)
    assert jnp.allclose(out2, ref2, atol=1e-5, rtol=1e-5), "ragged-batch mismatch"

    print("KERNEL_OK")
</pallas_src>

<mosaic_0001>
module attributes {stable_mosaic.version = 11 : i64} {
  func.func @_autoencoder_kernel(%arg0: i32, %arg1: memref<8x60xf32, #tpu.memory_space<vmem>>, %arg2: memref<60x32xf32, #tpu.memory_space<vmem>>, %arg3: memref<1x32xf32, #tpu.memory_space<vmem>>, %arg4: memref<32x16xf32, #tpu.memory_space<vmem>>, %arg5: memref<1x16xf32, #tpu.memory_space<vmem>>, %arg6: memref<16x32xf32, #tpu.memory_space<vmem>>, %arg7: memref<1x32xf32, #tpu.memory_space<vmem>>, %arg8: memref<32x60xf32, #tpu.memory_space<vmem>>, %arg9: memref<1x60xf32, #tpu.memory_space<vmem>>, %arg10: memref<8x60xf32, #tpu.memory_space<vmem>>) attributes {dimension_semantics = [#tpu.dimension_semantics<parallel>], iteration_bounds = array<i64: 1>, scalar_prefetch = 0 : i64, scratch_operands = 0 : i64, tpu.core_type = #tpu.core_type<tc>, window_params = [{transform_indices = @transform_0, window_bounds = array<i64: 8, 60>}, {pipeline_mode = #tpu.pipeline_mode<synchronous>, transform_indices = @transform_1, window_bounds = array<i64: 60, 32>}, {pipeline_mode = #tpu.pipeline_mode<synchronous>, transform_indices = @transform_2, window_bounds = array<i64: 1, 32>}, {pipeline_mode = #tpu.pipeline_mode<synchronous>, transform_indices = @transform_3, window_bounds = array<i64: 32, 16>}, {pipeline_mode = #tpu.pipeline_mode<synchronous>, transform_indices = @transform_4, window_bounds = array<i64: 1, 16>}, {pipeline_mode = #tpu.pipeline_mode<synchronous>, transform_indices = @transform_5, window_bounds = array<i64: 16, 32>}, {pipeline_mode = #tpu.pipeline_mode<synchronous>, transform_indices = @transform_6, window_bounds = array<i64: 1, 32>}, {pipeline_mode = #tpu.pipeline_mode<synchronous>, transform_indices = @transform_7, window_bounds = array<i64: 32, 60>}, {pipeline_mode = #tpu.pipeline_mode<synchronous>, transform_indices = @transform_8, window_bounds = array<i64: 1, 60>}, {transform_indices = @transform_9, window_bounds = array<i64: 8, 60>}]} {
    %c0 = arith.constant 0 : index
    %c0_0 = arith.constant 0 : index
    %0 = vector.load %arg1[%c0, %c0_0] : memref<8x60xf32, #tpu.memory_space<vmem>>, vector<8x60xf32>
    %c0_1 = arith.constant 0 : index
    %c0_2 = arith.constant 0 : index
    %1 = vector.load %arg2[%c0_1, %c0_2] : memref<60x32xf32, #tpu.memory_space<vmem>>, vector<60x32xf32>
    %cst = arith.constant dense<0.000000e+00> : vector<8x32xf32>
    %2 = tpu.matmul %0, %1, %cst {dimension_numbers = #tpu.dot_dimension_numbers<[1], [0], [0], [1], [0, 0, 1, 1], [], []>} : vector<8x60xf32>, vector<60x32xf32>, vector<8x32xf32> -> vector<8x32xf32>
    %c0_3 = arith.constant 0 : index
    %c0_4 = arith.constant 0 : index
    %3 = vector.load %arg3[%c0_3, %c0_4] : memref<1x32xf32, #tpu.memory_space<vmem>>, vector<1x32xf32>
    %4 = vector.broadcast %3 : vector<1x32xf32> to vector<8x32xf32>
    %5 = arith.addf %2, %4 : vector<8x32xf32>
    %cst_5 = arith.constant 0.000000e+00 : f32
    %6 = vector.broadcast %cst_5 : f32 to vector<8x32xf32>
    %7 = arith.maximumf %5, %6 : vector<8x32xf32>
    %c0_6 = arith.constant 0 : index
    %c0_7 = arith.constant 0 : index
    %8 = vector.load %arg4[%c0_6, %c0_7] : memref<32x16xf32, #tpu.memory_space<vmem>>, vector<32x16xf32>
    %cst_8 = arith.constant dense<0.000000e+00> : vector<8x16xf32>
    %9 = tpu.matmul %7, %8, %cst_8 {dimension_numbers = #tpu.dot_dimension_numbers<[1], [0], [0], [1], [0, 0, 1, 1], [], []>} : vector<8x32xf32>, vector<32x16xf32>, vector<8x16xf32> -> vector<8x16xf32>
    %c0_9 = arith.constant 0 : index
    %c0_10 = arith.constant 0 : index
    %10 = vector.load %arg5[%c0_9, %c0_10] : memref<1x16xf32, #tpu.memory_space<vmem>>, vector<1x16xf32>
    %11 = vector.broadcast %10 : vector<1x16xf32> to vector<8x16xf32>
    %12 = arith.addf %9, %11 : vector<8x16xf32>
    %cst_11 = arith.constant 0.000000e+00 : f32
    %13 = vector.broadcast %cst_11 : f32 to vector<8x16xf32>
    %14 = arith.maximumf %12, %13 : vector<8x16xf32>
    %c0_12 = arith.constant 0 : index
    %c0_13 = arith.constant 0 : index
    %15 = vector.load %arg6[%c0_12, %c0_13] : memref<16x32xf32, #tpu.memory_space<vmem>>, vector<16x32xf32>
    %cst_14 = arith.constant dense<0.000000e+00> : vector<8x32xf32>
    %16 = tpu.matmul %14, %15, %cst_14 {dimension_numbers = #tpu.dot_dimension_numbers<[1], [0], [0], [1], [0, 0, 1, 1], [], []>} : vector<8x16xf32>, vector<16x32xf32>, vector<8x32xf32> -> vector<8x32xf32>
    %c0_15 = arith.constant 0 : index
    %c0_16 = arith.constant 0 : index
    %17 = vector.load %arg7[%c0_15, %c0_16] : memref<1x32xf32, #tpu.memory_space<vmem>>, vector<1x32xf32>
    %18 = vector.broadcast %17 : vector<1x32xf32> to vector<8x32xf32>
    %19 = arith.addf %16, %18 : vector<8x32xf32>
    %cst_17 = arith.constant 0.000000e+00 : f32
    %20 = vector.broadcast %cst_17 : f32 to vector<8x32xf32>
    %21 = arith.maximumf %19, %20 : vector<8x32xf32>
    %c0_18 = arith.constant 0 : index
    %c0_19 = arith.constant 0 : index
    %22 = vector.load %arg8[%c0_18, %c0_19] : memref<32x60xf32, #tpu.memory_space<vmem>>, vector<32x60xf32>
    %cst_20 = arith.constant dense<0.000000e+00> : vector<8x60xf32>
    %23 = tpu.matmul %21, %22, %cst_20 {dimension_numbers = #tpu.dot_dimension_numbers<[1], [0], [0], [1], [0, 0, 1, 1], [], []>} : vector<8x32xf32>, vector<32x60xf32>, vector<8x60xf32> -> vector<8x60xf32>
    %c0_21 = arith.constant 0 : index
    %c0_22 = arith.constant 0 : index
    %24 = vector.load %arg9[%c0_21, %c0_22] : memref<1x60xf32, #tpu.memory_space<vmem>>, vector<1x60xf32>
    %25 = vector.broadcast %24 : vector<1x60xf32> to vector<8x60xf32>
    %26 = arith.addf %23, %25 : vector<8x60xf32>
    %c0_23 = arith.constant 0 : index
    %c0_24 = arith.constant 0 : index
    %27 = vector.load %arg10[%c0_23, %c0_24] : memref<8x60xf32, #tpu.memory_space<vmem>>, vector<8x60xf32>
    tpu.vector_store %arg10[%c0_23, %c0_24], %26 {strides = array<i32>} : memref<8x60xf32, #tpu.memory_space<vmem>>, vector<8x60xf32>,
    return
  }
  func.func @transform_0(%arg0: i32) -> (i32, i32) {
    %c0_i32 = arith.constant 0 : i32
    %c0_i32_0 = arith.constant 0 : i32
    return %arg0, %c0_i32 : i32, i32
  }
  func.func @transform_1(%arg0: i32) -> (i32, i32) {
    %c0_i32 = arith.constant 0 : i32
    %c0_i32_0 = arith.constant 0 : i32
    %c0_i32_1 = arith.constant 0 : i32
    return %c0_i32, %c0_i32_0 : i32, i32
  }
  func.func @transform_2(%arg0: i32) -> (i32, i32) {
    %c0_i32 = arith.constant 0 : i32
    %c0_i32_0 = arith.constant 0 : i32
    %c0_i32_1 = arith.constant 0 : i32
    return %c0_i32, %c0_i32_0 : i32, i32
  }
  func.func @transform_3(%arg0: i32) -> (i32, i32) {
    %c0_i32 = arith.constant 0 : i32
    %c0_i32_0 = arith.constant 0 : i32
    %c0_i32_1 = arith.constant 0 : i32
    return %c0_i32, %c0_i32_0 : i32, i32
  }
  func.func @transform_4(%arg0: i32) -> (i32, i32) {
    %c0_i32 = arith.constant 0 : i32
    %c0_i32_0 = arith.constant 0 : i32
    %c0_i32_1 = arith.constant 0 : i32
    return %c0_i32, %c0_i32_0 : i32, i32
  }
  func.func @transform_5(%arg0: i32) -> (i32, i32) {
    %c0_i32 = arith.constant 0 : i32
    %c0_i32_0 = arith.constant 0 : i32
    %c0_i32_1 = arith.constant 0 : i32
    return %c0_i32, %c0_i32_0 : i32, i32
  }
  func.func @transform_6(%arg0: i32) -> (i32, i32) {
    %c0_i32 = arith.constant 0 : i32
    %c0_i32_0 = arith.constant 0 : i32
    %c0_i32_1 = arith.constant 0 : i32
    return %c0_i32, %c0_i32_0 : i32, i32
  }
  func.func @transform_7(%arg0: i32) -> (i32, i32) {
    %c0_i32 = arith.constant 0 : i32
    %c0_i32_0 = arith.constant 0 : i32
    %c0_i32_1 = arith.constant 0 : i32
    return %c0_i32, %c0_i32_0 : i32, i32
  }
  func.func @transform_8(%arg0: i32) -> (i32, i32) {
    %c0_i32 = arith.constant 0 : i32
    %c0_i32_0 = arith.constant 0 : i32
    %c0_i32_1 = arith.constant 0 : i32
    return %c0_i32, %c0_i32_0 : i32, i32
  }
  func.func @transform_9(%arg0: i32) -> (i32, i32) {
    %c0_i32 = arith.constant 0 : i32
    %c0_i32_0 = arith.constant 0 : i32
    return %arg0, %c0_i32 : i32, i32
  }
}

</mosaic_0001>

<bundles_post_ra>
// kernel: tpu_custom_call.1
= control target key start
LH: loop header
LB: loop body
LE: loop exit
PB: predicated region body
PF: predicated region fallthrough
CT: control target
= control target key end

     0   :  { %v533_v3 = vmov 0.0|0.0   ;;  %vm534_vm0 = vmmov 0   ;;  %v535_v6 = vmov 0.0   ;;  %s686_s0 = inlined_call_operand.vmem [shape: f32[8,60], index: 0, kind: input, shape index: {}]   ;;  %s687_s1 = inlined_call_operand.vmem [shape: f32[60,32], index: 1, kind: input, shape index: {}]   ;;  %s688_s2 = inlined_call_operand.vmem [shape: f32[1,32], index: 2, kind: input, shape index: {}]   ;;  %s689_s3 = inlined_call_operand.vmem [shape: f32[32,16], index: 3, kind: input, shape index: {}]   ;;  %s690_s4 = inlined_call_operand.vmem [shape: f32[1,16], index: 4, kind: input, shape index: {}]   ;;  %s691_s5 = inlined_call_operand.vmem [shape: f32[16,32], index: 5, kind: input, shape index: {}]   ;;  %s692_s6 = inlined_call_operand.vmem [shape: f32[1,32], index: 6, kind: input, shape index: {}]   ;;  %s693_s7 = inlined_call_operand.vmem [shape: f32[32,60], index: 7, kind: input, shape index: {}]   ;;  %s694_s8 = inlined_call_operand.vmem [shape: f32[1,60], index: 8, kind: input, shape index: {}]   ;;  %s695_s9 = inlined_call_operand.hbm [shape: f32[8,60], index: 9, kind: output, shape index: {}]  }
   0x1   :  { %v34_v0 = vld [vmem:[%s687_s1] sm:$0xff]  ;;  %v35_v1 = vld [vmem:[%s687_s1 + $0x8] sm:$0xff]  ;;  %v36_v2 = vld [vmem:[%s687_s1 + $0x10] sm:$0xff]  ;;  %476 = vmatprep.subr.bf16.mxu0 %v533_v3  ;;  %489 = vmatprep.subr.bf16.mxu1 %v533_v3 }
   0x2   :  { %v477_v4 = vpack.c.bf16 %v35_v1, %v34_v0  ;;  %v37_v5 = vld [vmem:[%s687_s1 + $0x18] sm:$0xff]  ;;  %444 = vmatprep.mubr.msk.f32.mxu0 %vm534_vm0, %v535_v6  ;;  %455 = vmatprep.mubr.msk.f32.mxu1 %vm534_vm0, %v535_v6  ;;  %v128_v8 = vld [vmem:[%s689_s3] sm:$0xff]  ;;  %v129_v9 = vld [vmem:[%s689_s3 + $0x8] sm:$0xff] }
   0x3   :  { %v480_v7 = vpack.c.bf16 %v37_v5, %v36_v2  ;;  %v38_v10 = vld [vmem:[%s687_s1 + $0x20] sm:$0xff]  ;;  %v39_v11 = vld [vmem:[%s687_s1 + $0x28] sm:$0xff]  ;;  %v490_v12 = vpack.c.bf16 %v129_v9, %v128_v8 }
   0x4   :  { %478 = vmatpush3.bf16.msra.mxu0 %v477_v4 }
   0x5   :  { %479 = vmatprep.subr.bf16.mxu0 %v533_v3 }
   0x6   :  { %14 = vsyncpa [#allocation3], 0  ;;  %491 = vmatpush3.bf16.msra.mxu1 %v490_v12  ;;  %v483_v13 = vpack.c.bf16 %v39_v11, %v38_v10  ;;  %v40_v14 = vld [vmem:[%s687_s1 + $0x30] sm:$0xff]  ;;  %v41_v15 = vld [vmem:[%s687_s1 + $0x38] sm:$0xf]  ;;  %vm53_vm1 = vcmask 1043456  }
   0x7   :  { %492 = vmatprep.subr.bf16.mxu1 %v533_v3  ;;  %v486_v16 = vpack.c.bf16 %v41_v15, %v40_v14  ;;  %vm536_vm2 = vmmov 1   ;;  %v33_v17 = vld [vmem:[%s686_s0] sm:$0xff]  ;;  %vm49_vm4 = vcmask 490496   ;;  %v130_v18 = vld [vmem:[%s689_s3 + $0x10] sm:$0xff]  ;;  %v131_v19 = vld [vmem:[%s689_s3 + $0x18] sm:$0xff]  ;;  %vm139_vm5 = vcmask 261120  }
   0x8   :  { %481 = vmatpush3.bf16.msra.mxu0 %v480_v7  ;;  %vm487_vm3 = vmpackc.low %vm53_vm1, %vm536_vm2  ;;  %v493_v20 = vpack.c.bf16 %v131_v19, %v130_v18  ;;  %v397_v21 = vld [vmem:[%s688_s2] ss:$0 sm:$0xff]  ;;  %v215_v27 = vld [vmem:[%s691_s5 + $0x8] sm:$0xff]  ;;  %vm223_vm6 = vcmask 130048   ;;  %s537_s28 = smov [#allocation2]  }
   0x9   :  { %482 = vmatprep.subr.bf16.mxu0 %v533_v3  ;;  %v214_v26 = vld [vmem:[%s691_s5] sm:$0xff]  ;;  %v299_v31 = vld [vmem:[%s693_s7 + $0x8] sm:$0xff]  ;;  %v300_v37 = vld [vmem:[%s693_s7 + $0x10] sm:$0xff]  ;;  %s389_s29 = sshll.u32 %s537_s28, 4  ;;  %s390_s29 = int_to_ptr.vmem [resolvable:$true] %s389_s29 }
   0xa   :  { %494 = vmatpush3.bf16.msra.mxu1 %v493_v20  ;;  %v496_v28 = vpack.c.bf16 %v215_v27, %v214_v26  ;;  %v400_v29 = vld [vmem:[%s690_s4] ss:$0 sm:$0xff]  ;;  %v301_v38 = vld [vmem:[%s693_s7 + $0x18] sm:$0xff]  ;;  %p514_p1 = scmp.lt.s32.totalorder %s390_s29, %s390_s29 }
   0xb   :  { %495 = vmatprep.subr.bf16.mxu1 %v533_v3  ;;  %v298_v30 = vld [vmem:[%s693_s7] sm:$0xff]  ;;  %v502_v39 = vpack.c.bf16 %v301_v38, %v300_v37  ;;  %s509_s7 = scalar_lea.vmem %s390_s29, 128 }
   0xc   :  { %484 = vmatpush3.bf16.msra.mxu0 %v483_v13  ;;  %v499_v35 = vpack.c.bf16 %v299_v31, %v298_v30  ;;  %v402_v40 = vld [vmem:[%s692_s6] ss:$0 sm:$0xff]  ;;  %p510_p0 = scmp.ne.s32.totalorder %s390_s29, %s509_s7  ;;  %p515_p2 = scmp.lt.s32.totalorder %s509_s7, %s509_s7 }
   0xd   :  { %485 = vmatprep.subr.bf16.mxu0 %v533_v3  ;;  %v404_v45 = vld [vmem:[%s694_s8] ss:$0 sm:$0xff] }
   0xe   :  { %p516_p3 = por %p515_p2, %p514_p1 }
  0x10   :  { %488 = vmatpush3.bf16.msk.msra.mxu0 %vm487_vm3, %v486_v16  ;;  %p517_p4 = pnand %p516_p3, %p510_p0 }
  0x13   :  { %445 = vmatmul.mubr.msk.f32.vlgmr.msra.gmra.mrb[0].mxu0 %vm49_vm4, %v33_v17 }
  0xe6   :  { %v123_v22 = vpop.f32.mrb[0].mxu0 }
  0xe7   :  { %v124_v23 = vadd.f32 %v397_v21, %v123_v22  ;;  %v446_v24 = vpop.f32.mrb[1].mxu0 }
  0xe9   :  { %v127_v25 = vmax.f32 %v124_v23, 0.0 }
  0xeb   :  { %456 = vmatmul.mubr.msk.f32.vlgmr.msra.gmra.mrb[0].mxu1 %vm139_vm5, %v127_v25 }
  0xec   :  { %462 = vmatprep.mubr.msk.f32.mxu1 %vm534_vm0, %v535_v6  ;;  %497 = vmatpush3.bf16.msra.mxu1 %v496_v28 }
  0xed   :  { %498 = vmatprep.subr.bf16.mxu1 %v533_v3 }
 0x1be   :  { %v209_v32 = vpop.f32.mrb[0].mxu1 }
 0x1bf   :  { %v210_v33 = vadd.f32 %v400_v29, %v209_v32  ;;  %v457_v34 = vpop.f32.mrb[1].mxu1 }
 0x1c1   :  { %v213_v36 = vmax.f32 %v210_v33, 0.0 }
 0x1c3   :  { %463 = vmatmul.mubr.msk.f32.vlgmr.msra.gmra.mrb[2].mxu1 %vm223_vm6, %v213_v36 }
 0x1c4   :  { %500 = vmatpush3.bf16.msra.mxu1 %v499_v35  ;;  %473 = vmatprep.mubr.msk.f32.mxu1 %vm534_vm0, %v535_v6 }
 0x1c5   :  { %501 = vmatprep.subr.bf16.mxu1 %v533_v3 }
 0x1c8   :  { %503 = vmatpush3.bf16.msra.mxu1 %v502_v39 }
 0x296   :  { %v293_v41 = vpop.f32.mrb[2].mxu1 }
 0x297   :  { %v294_v42 = vadd.f32 %v402_v40, %v293_v41  ;;  %v464_v43 = vpop.f32.mrb[3].mxu1 }
 0x299   :  { %v297_v44 = vmax.f32 %v294_v42, 0.0 }
 0x29b   :  { %474 = vmatmul.mubr.msk.f32.vlgmr.msra.gmra.mrb[4].mxu1 %vm139_vm5, %v297_v44 }
 0x36e   :  { %v378_v46 = vpop.f32.mrb[4].mxu1 }
 0x36f   :  { %v379_v47 = vadd.f32 %v404_v45, %v378_v46  ;;  %v475_v48 = vpop.f32.mrb[5].mxu1 }
 0x371   :  { %382 = vst.msk [vmem:[#allocation2] sm:$0xff] %vm49_vm4, %v379_v47 }
 0x372   :  { %520 = shalt.err (!%p517_p4)
}
 0x373   :  { %s521_s10 = scalar_lea.hbm %s695_s9, 128 }
 0x374   :  { %p522_p5 = scmp.ne.s32.totalorder %s695_s9, %s521_s10  ;;  %p525_p6 = scmp.lt.u32.totalorder %s521_s10, %s695_s9 }
 0x376   :  { %p527_p7 = pnand %p525_p6, %p522_p5 }
 0x378   :  { %530 = shalt.err (!%p527_p7)
}
 0x379   :  { %392 = dma.vmem_to_hbm [thread:$0]  %s390_s29, 128, %s695_s9, [#allocation3]  }
 0x37a   :  { %531 = dma.done.wait [#allocation3], 128  }
 0x37b   :  { %532 = vsyncadd [#allocation3], 4294967168 }
 0x37c   :  { %396 = vsyncpa [#allocation3], 1 }

</bundles_post_ra>
